<compile_context>
chip_gen: v6e
topology: v6e:2x2x1
jax: 0.10.0
libtpu: 0.0.40
codegen_flags: <defaults>
</compile_context>

<pallas_src>
import functools

import jax
import jax.numpy as jnp
from jax.experimental import pallas as pl
from jax.experimental.pallas import tpu as pltpu


def _round_up(v, m):
    return (v + m - 1) // m * m


def _mlp_kernel(x_ref, w1_ref, b1_ref, w2_ref, b2_ref, o_ref):
    # Layer 1: [TM, K] @ [K, H] -> f32 accumulator, + bias (f32), ReLU (f32).
    h = jnp.dot(x_ref[...], w1_ref[...], preferred_element_type=jnp.float32)
    h = jnp.maximum(h + b1_ref[...], 0.0)
    # Layer 2: cast activation to the weight dtype (no-op for f32 weights,
    # deliberate for the bf16-operand path), accumulate in f32.
    out = jnp.dot(h.astype(w2_ref.dtype), w2_ref[...],
                  preferred_element_type=jnp.float32)
    o_ref[...] = (out + b2_ref[...]).astype(o_ref.dtype)


def prepare_mlp_params(w1, b1, w2, b2, compute_dtype=None):
    """One-time parameter prep, hoisted out of the per-call forward.

    Casts weights to the desired MXU operand dtype and reshapes biases to 2-D
    f32 rows (added to the f32 accumulator inside the kernel).
    """
    cdt = compute_dtype if compute_dtype is not None else w1.dtype
    return (w1.astype(cdt),
            b1.astype(jnp.float32).reshape(1, -1),
            w2.astype(cdt),
            b2.astype(jnp.float32).reshape(1, -1))


@functools.partial(jax.jit, static_argnames=("block_rows",))
def mlp_forward(x, w1, b1, w2, b2, *, block_rows=1024):
    """Fused MLP forward.

    x:  [N, in_features]
    w1: [in_features, hidden]      (transposed vs. PyTorch nn.Linear layout)
    b1: [1, hidden]        (from prepare_mlp_params)
    w2: [hidden, num_classes]
    b2: [1, num_classes]   (from prepare_mlp_params)
    returns: [N, num_classes] in x.dtype
    """
    n, in_f = x.shape
    hidden = w1.shape[1]
    num_classes = w2.shape[1]
    out_dtype = x.dtype
    cdt = w1.dtype  # MXU operand dtype is decided at prepare time.

    # Row-tile alignment: 8 rows for 32-bit operands, 16 for bf16 (sublane
    # packing), 32 for 8-bit.
    itemsize = jnp.dtype(cdt).itemsize
    row_align = max(8, 32 // itemsize)

    # Row tile: as large as block_rows allows, but never more than ceil(N/2)
    # (rounded up to row_align) so large-N cases always give the "parallel"
    # grid axis >= 2 steps to split across v7x's two TensorCores.
    half_rows = -(-n // 2)
    tm = min(block_rows, _round_up(half_rows, row_align))
    n_pad = _round_up(n, tm)

    x_c = x.astype(cdt)
    if n_pad != n:
        # Only row padding (to a tile multiple); no lane/column padding.
        x_c = jnp.pad(x_c, ((0, n_pad - n), (0, 0)))

    grid = (n_pad // tm,)

    cost = pl.CostEstimate(
        flops=2 * n_pad * (in_f * hidden + hidden * num_classes),
        transcendentals=0,
        bytes_accessed=(n_pad * in_f * itemsize
                        + in_f * hidden * itemsize
                        + hidden * num_classes * itemsize
                        + (hidden + num_classes) * 4
                        + n_pad * num_classes * jnp.dtype(out_dtype).itemsize),
    )

    out = pl.pallas_call(
        _mlp_kernel,
        out_shape=jax.ShapeDtypeStruct((n_pad, num_classes), out_dtype),
        grid=grid,
        in_specs=[
            # x: row-tiled along the grid axis; last dim equals the full
            # array dim, so no 128-lane padding is required or performed.
            pl.BlockSpec((tm, in_f), lambda i: (i, 0)),
            # Weights / biases: fully resident, same (tiny) block every step.
            pl.BlockSpec((in_f, hidden), lambda i: (0, 0)),
            pl.BlockSpec((1, hidden), lambda i: (0, 0)),
            pl.BlockSpec((hidden, num_classes), lambda i: (0, 0)),
            pl.BlockSpec((1, num_classes), lambda i: (0, 0)),
        ],
        # Output written unpadded: last dim equals the full array dim.
        out_specs=pl.BlockSpec((tm, num_classes), lambda i: (i, 0)),
        compiler_params=pltpu.CompilerParams(
            dimension_semantics=("parallel",),
        ),
        cost_estimate=cost,
    )(x_c, w1, b1, w2, b2)

    if n_pad != n:
        out = out[:n]
    return out


def init_mlp_params(key, in_features, hidden_channels, num_classes,
                    dtype=jnp.float32):
    """Deterministic init (uniform, PyTorch-Linear-style bounds).

    Weights returned already transposed to [in, out] for the kernel.
    """
    k1, k2, k3, k4 = jax.random.split(key, 4)
    bound1 = 1.0 / (in_features ** 0.5)
    bound2 = 1.0 / (hidden_channels ** 0.5)
    w1 = jax.random.uniform(k1, (in_features, hidden_channels),
                            minval=-bound1, maxval=bound1, dtype=dtype)
    b1 = jax.random.uniform(k2, (hidden_channels,),
                            minval=-bound1, maxval=bound1, dtype=dtype)
    w2 = jax.random.uniform(k3, (hidden_channels, num_classes),
                            minval=-bound2, maxval=bound2, dtype=dtype)
    b2 = jax.random.uniform(k4, (num_classes,),
                            minval=-bound2, maxval=bound2, dtype=dtype)
    return w1, b1, w2, b2


def _reference(x, w1, b1, w2, b2):
    return jnp.maximum(x @ w1 + b1, 0.0) @ w2 + b2


if __name__ == "__main__":
    IN_FEATURES = 16
    HIDDEN = 32
    NUM_CLASSES = 4

    key = jax.random.PRNGKey(0)
    kx1, kx2, kp = jax.random.split(key, 3)
    w1, b1, w2, b2 = init_mlp_params(kp, IN_FEATURES, HIDDEN, NUM_CLASSES)

    # One-time param prep (hoisted out of the jitted forward).
    params_f32 = prepare_mlp_params(w1, b1, w2, b2)
    params_bf16 = prepare_mlp_params(w1, b1, w2, b2,
                                     compute_dtype=jnp.bfloat16)

    # Case 1: small node batch, single grid step.
    N_SMALL = 8
    x_small = jax.random.normal(kx1, (N_SMALL, IN_FEATURES), dtype=jnp.float32)
    out_small = jax.block_until_ready(mlp_forward(x_small, *params_f32))
    ref_small = _reference(x_small, w1, b1, w2, b2)
    assert out_small.shape == (N_SMALL, NUM_CLASSES)
    assert jnp.allclose(out_small, ref_small, atol=1e-5, rtol=1e-5)

    # Case 2: larger node count -> 512-row tiles, 2 "parallel" grid steps
    # (splits across v7x's two TensorCores; pipelined x/out tiles elsewhere).
    N_LARGE = 1024
    x_large = jax.random.normal(kx2, (N_LARGE, IN_FEATURES), dtype=jnp.float32)
    out_large = jax.block_until_ready(mlp_forward(x_large, *params_f32))
    ref_large = _reference(x_large, w1, b1, w2, b2)
    assert out_large.shape == (N_LARGE, NUM_CLASSES)
    assert jnp.allclose(out_large, ref_large, atol=1e-5, rtol=1e-5)

    # Case 3: bf16 MXU operands / f32 accumulation (v6e/v7x-friendly path;
    # elementwise math stays f32 for v5e).
    out_bf16 = jax.block_until_ready(mlp_forward(x_large, *params_bf16))
    assert out_bf16.shape == (N_LARGE, NUM_CLASSES)
    assert jnp.allclose(out_bf16, ref_large, atol=5e-2, rtol=5e-2)

    print("KERNEL_OK")
</pallas_src>

<mosaic_0001>
module attributes {stable_mosaic.version = 11 : i64} {
  func.func @_mlp_kernel(%arg0: i32, %arg1: memref<8x16xf32, #tpu.memory_space<vmem>>, %arg2: memref<16x32xf32, #tpu.memory_space<vmem>>, %arg3: memref<1x32xf32, #tpu.memory_space<vmem>>, %arg4: memref<32x4xf32, #tpu.memory_space<vmem>>, %arg5: memref<1x4xf32, #tpu.memory_space<vmem>>, %arg6: memref<8x4xf32, #tpu.memory_space<vmem>>) attributes {dimension_semantics = [#tpu.dimension_semantics<parallel>], iteration_bounds = array<i64: 1>, scalar_prefetch = 0 : i64, scratch_operands = 0 : i64, tpu.core_type = #tpu.core_type<tc>, window_params = [{transform_indices = @transform_0, window_bounds = array<i64: 8, 16>}, {pipeline_mode = #tpu.pipeline_mode<synchronous>, transform_indices = @transform_1, window_bounds = array<i64: 16, 32>}, {pipeline_mode = #tpu.pipeline_mode<synchronous>, transform_indices = @transform_2, window_bounds = array<i64: 1, 32>}, {pipeline_mode = #tpu.pipeline_mode<synchronous>, transform_indices = @transform_3, window_bounds = array<i64: 32, 4>}, {pipeline_mode = #tpu.pipeline_mode<synchronous>, transform_indices = @transform_4, window_bounds = array<i64: 1, 4>}, {transform_indices = @transform_5, window_bounds = array<i64: 8, 4>}]} {
    %c0 = arith.constant 0 : index
    %c0_0 = arith.constant 0 : index
    %0 = vector.load %arg1[%c0, %c0_0] : memref<8x16xf32, #tpu.memory_space<vmem>>, vector<8x16xf32>
    %c0_1 = arith.constant 0 : index
    %c0_2 = arith.constant 0 : index
    %1 = vector.load %arg2[%c0_1, %c0_2] : memref<16x32xf32, #tpu.memory_space<vmem>>, vector<16x32xf32>
    %cst = arith.constant dense<0.000000e+00> : vector<8x32xf32>
    %2 = tpu.matmul %0, %1, %cst {dimension_numbers = #tpu.dot_dimension_numbers<[1], [0], [0], [1], [0, 0, 1, 1], [], []>} : vector<8x16xf32>, vector<16x32xf32>, vector<8x32xf32> -> vector<8x32xf32>
    %c0_3 = arith.constant 0 : index
    %c0_4 = arith.constant 0 : index
    %3 = vector.load %arg3[%c0_3, %c0_4] : memref<1x32xf32, #tpu.memory_space<vmem>>, vector<1x32xf32>
    %4 = vector.broadcast %3 : vector<1x32xf32> to vector<8x32xf32>
    %5 = arith.addf %2, %4 : vector<8x32xf32>
    %cst_5 = arith.constant 0.000000e+00 : f32
    %6 = vector.broadcast %cst_5 : f32 to vector<8x32xf32>
    %7 = arith.maximumf %5, %6 : vector<8x32xf32>
    %c0_6 = arith.constant 0 : index
    %c0_7 = arith.constant 0 : index
    %8 = vector.load %arg4[%c0_6, %c0_7] : memref<32x4xf32, #tpu.memory_space<vmem>>, vector<32x4xf32>
    %cst_8 = arith.constant dense<0.000000e+00> : vector<8x4xf32>
    %9 = tpu.matmul %7, %8, %cst_8 {dimension_numbers = #tpu.dot_dimension_numbers<[1], [0], [0], [1], [0, 0, 1, 1], [], []>} : vector<8x32xf32>, vector<32x4xf32>, vector<8x4xf32> -> vector<8x4xf32>
    %c0_9 = arith.constant 0 : index
    %c0_10 = arith.constant 0 : index
    %10 = vector.load %arg5[%c0_9, %c0_10] : memref<1x4xf32, #tpu.memory_space<vmem>>, vector<1x4xf32>
    %11 = vector.broadcast %10 : vector<1x4xf32> to vector<8x4xf32>
    %12 = arith.addf %9, %11 : vector<8x4xf32>
    %c0_11 = arith.constant 0 : index
    %c0_12 = arith.constant 0 : index
    %13 = vector.load %arg6[%c0_11, %c0_12] : memref<8x4xf32, #tpu.memory_space<vmem>>, vector<8x4xf32>
    tpu.vector_store %arg6[%c0_11, %c0_12], %12 {strides = array<i32>} : memref<8x4xf32, #tpu.memory_space<vmem>>, vector<8x4xf32>,
    return
  }
  func.func @transform_0(%arg0: i32) -> (i32, i32) {
    %c0_i32 = arith.constant 0 : i32
    %c0_i32_0 = arith.constant 0 : i32
    return %arg0, %c0_i32 : i32, i32
  }
  func.func @transform_1(%arg0: i32) -> (i32, i32) {
    %c0_i32 = arith.constant 0 : i32
    %c0_i32_0 = arith.constant 0 : i32
    %c0_i32_1 = arith.constant 0 : i32
    return %c0_i32, %c0_i32_0 : i32, i32
  }
  func.func @transform_2(%arg0: i32) -> (i32, i32) {
    %c0_i32 = arith.constant 0 : i32
    %c0_i32_0 = arith.constant 0 : i32
    %c0_i32_1 = arith.constant 0 : i32
    return %c0_i32, %c0_i32_0 : i32, i32
  }
  func.func @transform_3(%arg0: i32) -> (i32, i32) {
    %c0_i32 = arith.constant 0 : i32
    %c0_i32_0 = arith.constant 0 : i32
    %c0_i32_1 = arith.constant 0 : i32
    return %c0_i32, %c0_i32_0 : i32, i32
  }
  func.func @transform_4(%arg0: i32) -> (i32, i32) {
    %c0_i32 = arith.constant 0 : i32
    %c0_i32_0 = arith.constant 0 : i32
    %c0_i32_1 = arith.constant 0 : i32
    return %c0_i32, %c0_i32_0 : i32, i32
  }
  func.func @transform_5(%arg0: i32) -> (i32, i32) {
    %c0_i32 = arith.constant 0 : i32
    %c0_i32_0 = arith.constant 0 : i32
    return %arg0, %c0_i32 : i32, i32
  }
}

</mosaic_0001>

<bundles_post_ra>
// kernel: mlp_forward.1
= control target key start
LH: loop header
LB: loop body
LE: loop exit
PB: predicated region body
PF: predicated region fallthrough
CT: control target
= control target key end

     0   :  { %v228_v0 = vmov 0.0   ;;  %vm229_vm0 = vmmov 0   ;;  %vm30_vm1 = vcmask 130048   ;;  %vm116_vm2 = vcmask 261120   ;;  %s290_s1 = inlined_call_operand.vmem [shape: f32[16,32], index: 1, kind: input, shape index: {}]   ;;  %s291_s0 = inlined_call_operand.vmem [shape: f32[8,16], index: 0, kind: input, shape index: {}]   ;;  %s292_s3 = inlined_call_operand.vmem [shape: f32[32,4], index: 3, kind: input, shape index: {}]   ;;  %s293_s2 = inlined_call_operand.vmem [shape: f32[1,32], index: 2, kind: input, shape index: {}]   ;;  %s294_s4 = inlined_call_operand.vmem [shape: f32[1,4], index: 4, kind: input, shape index: {}]   ;;  %s295_s5 = inlined_call_operand.vmem [shape: f32[8,4], index: 5, kind: output, shape index: {}]  }
   0x1   :  { %208 = vmatprep.subr.mxu0 %v228_v0  ;;  %v22_v1 = vld [vmem:[%s290_s1 + $0x8] sm:$0xff]  ;;  %v21_v2 = vld [vmem:[%s290_s1] sm:$0xff]  ;;  %212 = vmatprep.mubr.msk.f32.mxu0 %vm229_vm0, %v228_v0  ;;  %v108_v4 = vld [vmem:[%s292_s3 + $0x18] sm:$0xff]  ;;  %vm190_vm3 = vcmask 31744  }
   0x2   :  { %209 = vmatpush3.msra.mxu0 %v22_v1  ;;  %v20_v3 = vld [vmem:[%s291_s0] sm:$0xff]  ;;  %215 = vmatprep.subr.mxu1 %v228_v0  ;;  %v107_v5 = vld [vmem:[%s292_s3 + $0x10] sm:$0xff]  ;;  %v106_v6 = vld [vmem:[%s292_s3 + $0x8] sm:$0xff] }
   0x3   :  { %210 = vmatprep.subr.mxu0 %v228_v0  ;;  %216 = vmatpush3.msra.mxu1 %v108_v4  ;;  %v105_v7 = vld [vmem:[%s292_s3] sm:$0xff] }
   0x4   :  { %211 = vmatpush3.msra.mxu0 %v21_v2  ;;  %217 = vmatprep.subr.mxu1 %v228_v0  ;;  %v196_v8 = vld [vmem:[%s293_s2] ss:$0 sm:$0xff] }
   0x5   :  { %213 = vmatmul.mubr.msk.f32.vlgmr.msra.gmra.mxu0 %vm30_vm1, %v20_v3  ;;  %223 = vmatprep.mubr.msk.f32.mxu1 %vm229_vm0, %v228_v0  ;;  %v198_v13 = vld [vmem:[%s294_s4] ss:$0 sm:$0xff] }
   0x6   :  { %218 = vmatpush3.msra.mxu1 %v107_v5 }
   0x7   :  { %219 = vmatprep.subr.mxu1 %v228_v0 }
   0x8   :  { %220 = vmatpush3.msra.mxu1 %v106_v6 }
   0x9   :  { %221 = vmatprep.subr.mxu1 %v228_v0 }
   0xa   :  { %222 = vmatpush3.msra.mxu1 %v105_v7 }
  0xc5   :  { %v100_v9 = vpop.f32.mrf.mxu0 }
  0xc6   :  { %v101_v10 = vadd.f32 %v196_v8, %v100_v9 }
  0xc7   :  { %v214_v11 = vpop.f32.mrf.mxu0 }
  0xc8   :  { %v104_v12 = vmax.f32 %v101_v10, 0.0 }
  0xca   :  { %224 = vmatmul.mubr.msk.f32.vlgmr.msra.gmra.mxu1 %vm116_vm2, %v104_v12 }
 0x18a   :  { %v186_v14 = vpop.f32.mrf.mxu1 }
 0x18b   :  { %v187_v15 = vadd.f32 %v198_v13, %v186_v14 }
 0x18c   :  { %v225_v16 = vpop.f32.mrf.mxu1 }
 0x18d   :  { %191 = vst.msk [vmem:[%s295_s5] sm:$0xff] %vm190_vm3, %v187_v15 }

</bundles_post_ra>
